<compile_context>
chip_gen: v7x
topology: tpu7x:2x2x1
jax: 0.10.0
libtpu: 0.0.40
codegen_flags: <defaults>
</compile_context>

<pallas_src>
import functools

import jax
import jax.numpy as jnp
from jax.experimental import pallas as pl
from jax.experimental.pallas import tpu as pltpu


def _round_up(x, m):
    return ((x + m - 1) // m) * m


def _celu(x, alpha=0.1):
    # CELU(alpha) as used by torchani networks; clamp the exp argument.
    return jnp.where(x > 0, x, alpha * (jnp.exp(jnp.minimum(x, 0.0) / alpha) - 1.0))


def _ensemble_kernel(x_ref, w1_ref, b1_ref, w2_ref, out_ref, *, h_chunk):
    """One row tile: fused-member GEMM + CELU + weighted lane reduction.

    x_ref : [TN, D]   activation row tile, streamed from HBM (f32 or bf16)
    w1_ref: [D,  Hc]  fused member weights (bf16 or f32), VMEM-resident
    b1_ref: [1,  Hc]  fused member biases (f32)
    w2_ref: [1,  Hc]  fused second-layer weights, pre-scaled by 1/M (f32)
    out_ref:[TN, 1]   ensemble-averaged per-atom energy (without the b2 mean)

    The fused hidden axis Hc is processed in `h_chunk`-lane chunks so the CELU
    intermediate never lives as a full [TN, Hc] f32 array.  Static Python loop
    with static ref slices -> zero-cost views, small fixed trip count.
    """
    tn = x_ref.shape[0]
    hc = w1_ref.shape[1]
    # Cast the streamed activations once to the weights' dtype (bf16 by
    # default -> full MXU rate on v5e/v6e/v7x; accumulation stays f32).
    xb = x_ref[...].astype(w1_ref.dtype)

    acc = jnp.zeros((tn, 1), jnp.float32)
    for c0 in range(0, hc, h_chunk):
        c1 = min(c0 + h_chunk, hc)
        h = jnp.dot(xb, w1_ref[:, c0:c1], preferred_element_type=jnp.float32)
        h = _celu(h + b1_ref[:, c0:c1], alpha=0.1)            # VPU + EUP, f32
        # Second layer + ensemble mean: VPU multiply + XLU lane reduction
        # (keeps the MXU free; a [Hc,1] matmul would waste its output width).
        acc = acc + jnp.sum(h * w2_ref[:, c0:c1], axis=-1, keepdims=True)
    out_ref[...] = acc


def prepare_ensemble_params(params, *, weight_dtype=jnp.bfloat16, hc_align=256):
    """Fuse ensemble members into one wide layer.  Call ONCE, not per forward.

    params = (W1 [M,D,H], b1 [M,H], W2 [M,H,1], b2 [M,1]).
    Returns (w1p [D,Hc], b1p [1,Hc], w2p [1,Hc], b2_mean) with the fused hidden
    axis zero-padded to a multiple of `hc_align` lanes (256 fills the v6e/v7x
    256x256 MXU tile; harmless on v5e) and the 1/M ensemble mean folded into
    w2p.  bf16 weights are MXU-native on all generations; pass
    weight_dtype=jnp.float32 if full f32 GEMM precision is required.
    """
    w1, b1, w2, b2 = params
    M, D, H = w1.shape
    w1c = jnp.transpose(w1, (1, 0, 2)).reshape(D, M * H)       # [D, M*H]
    b1c = b1.reshape(1, M * H)
    w2c = w2.reshape(1, M * H) / jnp.float32(M)                 # fold the mean
    b2_mean = jnp.mean(b2.astype(jnp.float32))

    Hc = _round_up(M * H, hc_align)
    pad = Hc - M * H                                            # zeros -> contribute 0
    w1p = jnp.pad(w1c, ((0, 0), (0, pad))).astype(weight_dtype)
    b1p = jnp.pad(b1c, ((0, 0), (0, pad))).astype(jnp.float32)
    w2p = jnp.pad(w2c, ((0, 0), (0, pad))).astype(jnp.float32)
    return w1p, b1p, w2p, b2_mean


def ensemble_forward(species, aev, prepped, *, tile_n=1024, h_chunk=512):
    """species: [B, A] int (passed through); aev: [B, A, D] float.

    prepped = prepare_ensemble_params(params) (weight prep hoisted out of the
    per-call path).  Returns (species, energies [B]) — the ensemble average.
    """
    w1p, b1p, w2p, b2_mean = prepped
    B, A, D = aev.shape
    N = B * A
    Hc = w1p.shape[1]

    # Pure metadata reshape — no extra HBM pass, no padding, no cast of x.
    # (If the AEV producer can emit bf16 directly, pass it through unchanged:
    # the kernel casts to the weight dtype internally.)
    x = aev.reshape(N, D)

    # Row-tile size: multiple of 8 sublanes; ensure >= 2 tiles so the parallel
    # axis can shard across both TensorCores on v7x.
    TN = min(tile_n, _round_up(N, 8))
    if pl.cdiv(N, TN) == 1 and N >= 16:
        TN = _round_up(pl.cdiv(N, 2), 8)
    num_tiles = pl.cdiv(N, TN)

    h_chunk_eff = min(_round_up(h_chunk, 128), Hc)

    # VMEM budget: double-buffered x tiles + single-buffered weights + live
    # GEMM/CELU chunk.  Clamp to [32 MiB, 56 MiB]: raises v5e/v6e default
    # scoped limits, stays below v7x's 64 MiB/TC physical VMEM.
    x_bytes = jnp.dtype(x.dtype).itemsize
    w_bytes = jnp.dtype(w1p.dtype).itemsize
    est = (2 * TN * D * x_bytes            # pipelined x tiles
           + D * Hc * w_bytes              # fused W1 (single-buffered)
           + 2 * Hc * 4                    # b1, w2
           + 2 * TN * 4                    # output tiles
           + TN * D * 2                    # in-kernel bf16 copy of x tile
           + 2 * TN * h_chunk_eff * 4)     # live GEMM/CELU chunk
    vmem_limit = int(min(max(2 * est, 32 * 1024 * 1024), 56 * 1024 * 1024))

    kernel = functools.partial(_ensemble_kernel, h_chunk=h_chunk_eff)

    per_atom = pl.pallas_call(
        kernel,
        out_shape=jax.ShapeDtypeStruct((N, 1), jnp.float32),
        grid_spec=pltpu.PrefetchScalarGridSpec(
            num_scalar_prefetch=0,
            grid=(num_tiles,),
            in_specs=[
                # Streamed activation row tile; full-D block (exempt from the
                # 128-lane rule), partial last tile handled by Pallas.
                pl.BlockSpec((TN, D), lambda n: (n, 0)),
                # Constant-index weights: fetched once, single-buffered.
                pl.BlockSpec((D, Hc), lambda n: (0, 0),
                             pipeline_mode=pl.Buffered(1)),
                pl.BlockSpec((1, Hc), lambda n: (0, 0),
                             pipeline_mode=pl.Buffered(1)),
                pl.BlockSpec((1, Hc), lambda n: (0, 0),
                             pipeline_mode=pl.Buffered(1)),
            ],
            out_specs=pl.BlockSpec((TN, 1), lambda n: (n, 0)),
        ),
        compiler_params=pltpu.CompilerParams(
            dimension_semantics=("parallel",),   # row tiles independent
            vmem_limit_bytes=vmem_limit),
    )(x, w1p, b1p, w2p)

    # Per-molecule energies; the per-atom b2 mean contributes A * mean(b2).
    energies = per_atom.reshape(B, A).sum(axis=-1) + A * b2_mean
    return species, energies


def _reference(species, aev, params):
    w1, b1, w2, b2 = params
    M = w1.shape[0]
    B, A, D = aev.shape
    x = aev.reshape(B * A, D).astype(jnp.float32)
    total = 0.0
    for m in range(M):
        h = _celu(x @ w1[m] + b1[m][None, :], alpha=0.1)
        e = h @ w2[m] + b2[m][None, :]
        total = total + e.reshape(B, A).sum(axis=-1)
    return species, total / M


if __name__ == "__main__":
    key = jax.random.PRNGKey(0)
    B, A, D, H, M = 2, 8, 32, 32, 4   # batch, atoms, AEV dim, hidden, ensemble size

    k1, k2, k3, k4, k5, k6 = jax.random.split(key, 6)
    species = jax.random.randint(k1, (B, A), 0, 4, dtype=jnp.int32)
    aev = jax.random.normal(k2, (B, A, D), dtype=jnp.float32)

    # Deterministic per-member parameters (stacked on leading member axis).
    w1 = 0.1 * jax.random.normal(k3, (M, D, H), dtype=jnp.float32)
    b1 = 0.1 * jax.random.normal(k4, (M, H), dtype=jnp.float32)
    w2 = 0.1 * jax.random.normal(k5, (M, H, 1), dtype=jnp.float32)
    b2 = 0.1 * jax.random.normal(k6, (M, 1), dtype=jnp.float32)
    params = (w1, b1, w2, b2)

    _, ref_e = _reference(species, aev, params)

    # f32-weight path (exact GEMM; tight tolerance).
    prepped_f32 = prepare_ensemble_params(params, weight_dtype=jnp.float32)
    sp_out, energies = ensemble_forward(species, aev, prepped_f32, tile_n=128)
    energies = jax.block_until_ready(energies)
    assert sp_out.shape == species.shape and jnp.array_equal(sp_out, species)
    assert energies.shape == (B,)
    assert jnp.allclose(energies, ref_e, rtol=1e-5, atol=1e-5)

    # bf16-weight path (default; MXU-native on v5e/v6e/v7x, f32 accumulation).
    prepped_bf16 = prepare_ensemble_params(params)   # weight_dtype=bfloat16
    _, energies_bf16 = ensemble_forward(species, aev, prepped_bf16, tile_n=128)
    energies_bf16 = jax.block_until_ready(energies_bf16)
    assert jnp.allclose(energies_bf16, ref_e, rtol=5e-2, atol=5e-2)

    print("KERNEL_OK")
</pallas_src>

<mosaic_0001>
module attributes {stable_mosaic.version = 11 : i64} {
  func.func @_ensemble_kernel(%arg0: i32, %arg1: memref<8x32xf32, #tpu.memory_space<vmem>>, %arg2: memref<32x256xf32, #tpu.memory_space<vmem>>, %arg3: memref<1x256xf32, #tpu.memory_space<vmem>>, %arg4: memref<1x256xf32, #tpu.memory_space<vmem>>, %arg5: memref<8x1xf32, #tpu.memory_space<vmem>>) attributes {dimension_semantics = [#tpu.dimension_semantics<parallel>], iteration_bounds = array<i64: 2>, scalar_prefetch = 0 : i64, scratch_operands = 0 : i64, tpu.core_type = #tpu.core_type<tc>, window_params = [{transform_indices = @transform_0, window_bounds = array<i64: 8, 32>}, {pipeline_mode = #tpu.pipeline_mode<synchronous>, transform_indices = @transform_1, window_bounds = array<i64: 32, 256>}, {pipeline_mode = #tpu.pipeline_mode<synchronous>, transform_indices = @transform_2, window_bounds = array<i64: 1, 256>}, {pipeline_mode = #tpu.pipeline_mode<synchronous>, transform_indices = @transform_3, window_bounds = array<i64: 1, 256>}, {transform_indices = @transform_4, window_bounds = array<i64: 8, 1>}]} {
    %c0 = arith.constant 0 : index
    %c0_0 = arith.constant 0 : index
    %0 = vector.load %arg1[%c0, %c0_0] : memref<8x32xf32, #tpu.memory_space<vmem>>, vector<8x32xf32>
    %cst = arith.constant 0.000000e+00 : f32
    %1 = vector.broadcast %cst : f32 to vector<8x1xf32>
    %c0_1 = arith.constant 0 : index
    %c0_2 = arith.constant 0 : index
    %2 = vector.load %arg2[%c0_1, %c0_2] : memref<32x256xf32, #tpu.memory_space<vmem>>, vector<32x256xf32>
    %cst_3 = arith.constant dense<0.000000e+00> : vector<8x256xf32>
    %3 = tpu.matmul %0, %2, %cst_3 {dimension_numbers = #tpu.dot_dimension_numbers<[1], [0], [0], [1], [0, 0, 1, 1], [], []>} : vector<8x32xf32>, vector<32x256xf32>, vector<8x256xf32> -> vector<8x256xf32>
    %c0_4 = arith.constant 0 : index
    %c0_5 = arith.constant 0 : index
    %4 = vector.load %arg3[%c0_4, %c0_5] : memref<1x256xf32, #tpu.memory_space<vmem>>, vector<1x256xf32>
    %5 = vector.broadcast %4 : vector<1x256xf32> to vector<8x256xf32>
    %6 = arith.addf %3, %5 : vector<8x256xf32>
    %cst_6 = arith.constant 0.000000e+00 : f32
    %7 = vector.broadcast %cst_6 : f32 to vector<8x256xf32>
    %8 = arith.cmpf ogt, %6, %7 : vector<8x256xf32>
    %cst_7 = arith.constant 0.000000e+00 : f32
    %9 = vector.broadcast %cst_7 : f32 to vector<8x256xf32>
    %10 = arith.minimumf %6, %9 : vector<8x256xf32>
    %cst_8 = arith.constant 1.000000e-01 : f32
    %11 = vector.broadcast %cst_8 : f32 to vector<8x256xf32>
    %12 = arith.divf %10, %11 : vector<8x256xf32>
    %13 = math.exp %12 : vector<8x256xf32>
    %cst_9 = arith.constant 1.000000e+00 : f32
    %14 = vector.broadcast %cst_9 : f32 to vector<8x256xf32>
    %15 = arith.subf %13, %14 : vector<8x256xf32>
    %cst_10 = arith.constant 1.000000e-01 : f32
    %16 = vector.broadcast %cst_10 : f32 to vector<8x256xf32>
    %17 = arith.mulf %16, %15 : vector<8x256xf32>
    %18 = arith.select %8, %6, %17 : vector<8x256xi1>, vector<8x256xf32>
    %c0_11 = arith.constant 0 : index
    %c0_12 = arith.constant 0 : index
    %19 = vector.load %arg4[%c0_11, %c0_12] : memref<1x256xf32, #tpu.memory_space<vmem>>, vector<1x256xf32>
    %20 = vector.broadcast %19 : vector<1x256xf32> to vector<8x256xf32>
    %21 = arith.mulf %18, %20 : vector<8x256xf32>
    %cst_13 = arith.constant dense<0.000000e+00> : vector<8xf32>
    %22 = vector.multi_reduction <add>, %21, %cst_13 [1] : vector<8x256xf32> to vector<8xf32>
    %23 = vector.shape_cast %22 : vector<8xf32> to vector<8x1xf32>
    %24 = arith.addf %1, %23 : vector<8x1xf32>
    %c0_14 = arith.constant 0 : index
    %c0_15 = arith.constant 0 : index
    %25 = vector.load %arg5[%c0_14, %c0_15] : memref<8x1xf32, #tpu.memory_space<vmem>>, vector<8x1xf32>
    tpu.vector_store %arg5[%c0_14, %c0_15], %24 {strides = array<i32>} : memref<8x1xf32, #tpu.memory_space<vmem>>, vector<8x1xf32>,
    return
  }
  func.func @transform_0(%arg0: i32) -> (i32, i32) {
    %c0_i32 = arith.constant 0 : i32
    %c0_i32_0 = arith.constant 0 : i32
    return %arg0, %c0_i32 : i32, i32
  }
  func.func @transform_1(%arg0: i32) -> (i32, i32) {
    %c0_i32 = arith.constant 0 : i32
    %c0_i32_0 = arith.constant 0 : i32
    %c0_i32_1 = arith.constant 0 : i32
    return %c0_i32, %c0_i32_0 : i32, i32
  }
  func.func @transform_2(%arg0: i32) -> (i32, i32) {
    %c0_i32 = arith.constant 0 : i32
    %c0_i32_0 = arith.constant 0 : i32
    %c0_i32_1 = arith.constant 0 : i32
    return %c0_i32, %c0_i32_0 : i32, i32
  }
  func.func @transform_3(%arg0: i32) -> (i32, i32) {
    %c0_i32 = arith.constant 0 : i32
    %c0_i32_0 = arith.constant 0 : i32
    %c0_i32_1 = arith.constant 0 : i32
    return %c0_i32, %c0_i32_0 : i32, i32
  }
  func.func @transform_4(%arg0: i32) -> (i32, i32) {
    %c0_i32 = arith.constant 0 : i32
    %c0_i32_0 = arith.constant 0 : i32
    return %arg0, %c0_i32 : i32, i32
  }
}

</mosaic_0001>

<bundles_post_ra>
// kernel: tpu_custom_call.1
= control target key start
LH: loop header
LB: loop body
LE: loop exit
PB: predicated region body
PF: predicated region fallthrough
CT: control target
= control target key end

     0   :  { %9 = vsyncpa [#allocation3], 0  ;;  %s789_s0 = inlined_call_operand.hbm [shape: f32[16,32], index: 0, kind: input, shape index: {}]   ;;  %s790_s1 = inlined_call_operand.hbm [shape: f32[32,256], index: 1, kind: input, shape index: {}]   ;;  %s791_s2 = inlined_call_operand.vmem [shape: f32[1,256], index: 2, kind: input, shape index: {}]   ;;  %s792_s3 = inlined_call_operand.vmem [shape: f32[1,256], index: 3, kind: input, shape index: {}]   ;;  %s793_s4 = inlined_call_operand.vmem [shape: f32[16,1], index: 4, kind: output, shape index: {}]  }
   0x1   :  { %11 = vsyncpa [#allocation3 + $0x1], 0 }
   0x2   :  { %12 = vsyncpa [#allocation5], 0  ;;  %s644_s15 = smov 0   ;;  %s646_s16 = smov 0  }
   0x3   :  { %s648_s17 = smov 0   ;;  %s650_s18 = smov 0  }
   0x4 LB: > { %s663_s19 = sadd.s32 4294967295, %s612_s18   ;;  %p38_p0 = scmp.ne.s32.totalorder %s604_s16, %s600_s15  ;;  %s612_s18 = sphi %s650_s18, %s808_s18   ;;  %s608_s17 = sphi %s648_s17, %s807_s17   ;;  %s604_s16 = sphi %s646_s16, %s806_s16   ;;  %s600_s15 = sphi %s644_s15, %s805_s15  }
   0x5   : > { %p794_p1 = scmp.eq.s32.totalorder %s663_s19, 0  ;;  %p437_p2 = scmp.ge.s32.totalorder %s612_s18, 1 }
   0x6   : > { %p138_p3 = scmp.lt.s32.totalorder %s612_s18, 3  ;;  %s614_s22 = smov [#allocation4]  }
   0x7   : > { %p671_p4 = por %p794_p1, %p38_p0  ;;  %s150_s23 = sshll.u32 %s614_s22, 4  ;;  %s151_s23 = int_to_ptr.vmem [resolvable:$true] %s150_s23 }
   0x8   : > { %p675_p5 = pnand %p437_p2, %p138_p3  ;;  %s688_s25 = sadd.s32 1, %s612_s18  }
   0x9   : > { %s797_s20 = scalar_select %p671_p4, 1, 0 }
   0xa   : > { %s798_s21 = scalar_select %p675_p5, 1, 0 }
   0xb   : > { %p465_p6 = pneg %p675_p5  ;;  %s25_s26 = sadd.s32 1, %s608_s17 }
   0xc   : > { %s22_s27 = ssub.s32 %s612_s18, %s688_s25  ;;  %s516_s30 = scalar_lea.hbm %s790_s1, 1024 }
   0xd   : > { %p683_p7 = pnand %p465_p6, %p794_p1  ;;  %p517_p8 = scmp.ne.s32.totalorder %s790_s1, %s516_s30 }
   0xe   : > { %p523_p12 = scmp.lt.u32.totalorder %s516_s30, %s790_s1 }
   0xf   : > { %p518_p9 = pneg %p683_p7 }
  0x11   : > { %p519_p10 = pnand %p518_p9, %p517_p8 }
  0x13   : > { %p520_p11 = pneg %p519_p10 }
  0x15   : > { %p525_p13 = pnand %p523_p12, %p520_p11 }
  0x17   : > { %528 = shalt.err (!%p525_p13)
}
  0x18   : > { %s529_s9 = scalar_lea.vmem %s151_s23, 1024  ;;  %p537_p6 = scmp.lt.s32.totalorder %s151_s23, %s151_s23 }
  0x19   : > { %p530_p0 = scmp.ne.s32.totalorder %s151_s23, %s529_s9  ;;  %p538_p1 = scmp.lt.s32.totalorder %s529_s9, %s529_s9 }
  0x1b   : > { %p532_p2 = pnand %p530_p0, %p518_p9  ;;  %p539_p4 = por %p538_p1, %p537_p6 }
  0x1d   : > { %p533_p3 = pneg %p532_p2 }
  0x1f   : > { %p540_p5 = pnand %p539_p4, %p533_p3 }
  0x21   : > { %543 = shalt.err (!%p540_p5)
}
  0x22   : > { %s615_s10 = smov 256   ;;  %s616_s11 = smov 16  }
  0x23   : > { %468 = dma.hbm_to_vmem [thread:$0]  (!%p683_p7), %s790_s1, 1024, %s151_s23, [#allocation5], %s615_s10, %s615_s10, %s616_s11  }
  0x24   : > { %p23_p8 = scmp.eq.s32.totalorder %s22_s27, 0  ;;  %p32_p9 = scmp.ne.s32.totalorder %s608_s17, %s604_s16 }
  0x25   : > { %p33_p1 = scmp.eq.s32.totalorder %s612_s18, 0  ;;  %p474_p4 = scmp.lt.s32.totalorder %s612_s18, 2 }
  0x26   : > { %s714_s14 = scalar_select %p23_p8, %s608_s17, %s25_s26  }
  0x27   : > { %p34_p5 = por %p33_p1, %p32_p9  ;;  %s170_s15 = sand.u32 1, %s608_s17  }
  0x28   : > { %s440_s22 = sshll.u32 %s170_s15, 3  ;;  %s441_s28 = sshll.u32 %s612_s18, 7 }
  0x29   : > { %s721_s5 = scalar_lea.hbm %s789_s0, %s441_s28  ;;  %s174_s23 = scalar_lea.vmem [#allocation2], %s440_s22 }
  0x2a   : > { %s181_s24 = sshll.u32 %s174_s23, 4  ;;  %p725_p7 = pnand %p474_p4, %p34_p5  ;;  %s723_s24 = int_to_ptr.vmem [resolvable:$true] %s181_s24 }
  0x2b   : > { %s171_s18 = scalar_lea.sflag [#allocation3], %s170_s15  ;;  %s544_s27 = scalar_lea.hbm %s721_s5, 128 }
  0x2c   : > { %p545_p10 = scmp.ne.s32.totalorder %s721_s5, %s544_s27  ;;  %p546_p11 = pneg %p725_p7 }
  0x2d   : > { %s549_s8 = scalar_lea.hbm %s789_s0, 256  ;;  %p550_p0 = scmp.lt.u32.totalorder %s721_s5, %s789_s0 }
  0x2e   : > { %p547_p12 = pnand %p546_p11, %p545_p10  ;;  %p551_p2 = scmp.lt.u32.totalorder %s549_s8, %s544_s27 }
  0x2f   : > { %p553_p6 = scmp.lt.u32.totalorder %s544_s27, %s721_s5 }
  0x30   : > { %p548_p13 = pneg %p547_p12  ;;  %p552_p3 = por %p551_p2, %p550_p0 }
  0x32   : > { %p554_p8 = por %p553_p6, %p552_p3 }
  0x34   : > { %p555_p9 = pnand %p554_p8, %p548_p13 }
  0x36   : > { %558 = shalt.err (!%p555_p9)
}
  0x37   : > { %s559_s11 = scalar_lea.vmem %s723_s24, 128  ;;  %s617_s12 = smov [#allocation2]  }
  0x38   : > { %p560_p1 = scmp.ne.s32.totalorder %s723_s24, %s559_s11  ;;  %s564_s13 = sshll.u32 %s617_s12, 4  ;;  %s565_s13 = int_to_ptr.vmem [resolvable:$false] %s564_s13 }
  0x39   : > { %s566_s15 = scalar_lea.vmem %s565_s13, 256  ;;  %p567_p10 = scmp.lt.s32.totalorder %s723_s24, %s565_s13 }
  0x3a   : > { %p562_p4 = pnand %p560_p1, %p546_p11  ;;  %p568_p12 = scmp.lt.s32.totalorder %s566_s15, %s559_s11 }
  0x3c   : > { %p563_p5 = pneg %p562_p4  ;;  %p569_p0 = por %p568_p12, %p567_p10 }
  0x3e   : > { %p570_p2 = pnand %p569_p0, %p563_p5 }
  0x40   : > { %573 = shalt.err (!%p570_p2)
}
  0x41   : > { %472 = dma.hbm_to_vmem [thread:$0]  (!%p725_p7), %s721_s5, 128, %s723_s24, %s171_s18  }
  0x42   : > { %p801_p13 = scmp.ne.s32.totalorder %s798_s21, 0 }
  0x43   : > { %s192_s22 = sand.u32 (!%p801_p13), 1, %s604_s16   ;;  %p802_p11 = scmp.ne.s32.totalorder (!%p801_p13), %s797_s20, 0 }
  0x44   : > { %190 = sbr.rel (%p801_p13) target bundleno = 474 (0x1da), region = 36  ;;  %s443_s28 = sshll.u32 (!%p801_p13), %s192_s22, 3 }
  0x45   : > { %s193_s29 = scalar_lea.sflag (!%p801_p13), [#allocation3], %s192_s22  ;;  %s196_s30 = scalar_lea.vmem (!%p801_p13), [#allocation2], %s443_s28 }
  0x4b   : > { %591 = dma.done.wait (%p802_p11), %s193_s29, 128  }
  0x4c   : > { %593 = vsyncadd (%p802_p11), %s193_s29, 4294967168  ;;  %p803_p3 = scmp.eq.s32.totalorder %s663_s19, 0 }
  0x4e   : > { %595 = dma.done.wait (%p803_p3), [#allocation5], 1024   ;;  %p804_p6 = pmov %p803_p3 }
  0x4f   : > { %v618_v0 = vmov 0.0   ;;  %v230_v1 = vld [vmem:[#allocation4 + $0x8] sm:$0xff]  ;;  %v232_v2 = vld [vmem:[#allocation4 + $0x18] sm:$0xff]  ;;  %v229_v3 = vld [vmem:[#allocation4] sm:$0xff]  ;;  %vm249_vm0 = vcmask 261120   ;;  %v239_v14 = vlaneseq  ;;  %p224_p7 = scmp.lt.s32.totalorder %s663_s19, 1 }
  0x50   : > { %597 = vsyncadd (%p804_p6), [#allocation5], 4294966272  ;;  %317 = vmatprep.mubr.f32.mxu0 %v618_v0  ;;  %v451_v4 = vpack.c.bf16 %v232_v2, %v230_v1  ;;  %v231_v5 = vld [vmem:[#allocation4 + $0x10] sm:$0xff]  ;;  %v234_v6 = vld [vmem:[#allocation4 + $0x28] sm:$0xff]  ;;  %vm359_vm3 = vcmask 7168  }
  0x51   : > { %v236_v7 = vld [vmem:[#allocation4 + $0x38] sm:$0xff]  ;;  %v453_v8 = vpack.c.bf16 %v231_v5, %v229_v3  ;;  %v233_v10 = vld [vmem:[#allocation4 + $0x20] sm:$0xff]  ;;  %v235_v11 = vld [vmem:[#allocation4 + $0x30] sm:$0xff]  ;;  %v240_v15 = vshrl.u32 %v239_v14, 7  ;;  %s810_s19 = smov (!%p224_p7, %s663_s19), 1 }
  0x52   : > { %v455_v9 = vpack.c.bf16 %v236_v7, %v234_v6  ;;  %452 = vmatprep.subr.bf16.mxu0 %v451_v4  ;;  %v457_v12 = vpack.c.bf16 %v235_v11, %v233_v10  ;;  %v228_v13 = vld [vmem:[%s196_s30] sm:$0xff]  ;;  %v237_v17 = vld [vmem:[%s791_s2] sm:$0x3]  ;;  %s445_s24 = sshll.u32 %s810_s19, 3 }
  0x53   : > { %454 = vmatpush1.bf16.msra.mxu0 %v453_v8  ;;  %v241_v16 = vsub.s32 0, %v240_v15  ;;  %v245_v18 = vsub.s32 1, %v240_v15  ;;  %v341_v31 = vld [vmem:[%s792_s3] sm:$0x3]  ;;  %s227_s27 = scalar_lea.vmem %s793_s4, %s445_s24 }
  0x54   : > { %456 = vmatprep.subr.bf16.mxu0 %v455_v9 }
  0x55   : > { %v242_v19 = vrot.slane %v237_v17, %v241_v16  ;;  %v246_v20 = vrot.slane %v237_v17, %v245_v18  ;;  %v346_v36 = vrot.slane %v341_v31, %v241_v16  ;;  %v350_v38 = vrot.slane %v341_v31, %v245_v18 }
  0x57   : > { %458 = vmatpush1.bf16.msra.mxu0 %v457_v12 }
  0x5a   : > { %446 = vmatmul.mubr.msk.f32.vlgmr.msra.gmra.mrb[0].mxu0 %vm249_vm0, %v228_v13 }
 0x12d   : > { %v319_v21 = vpop.f32.mrb[0].mxu0 }
 0x12e   : > { %v320_v22 = vadd.f32 %v319_v21, %v242_v19  ;;  %v321_v23 = vpop.f32.mrb[1].mxu0 }
 0x12f   : > { %v322_v24 = vadd.f32 %v321_v23, %v246_v20 }
 0x130   : > { %v326_v25 = vmin.f32 %v320_v22, 0.0  ;;  %vm324_vm1 = vcmp.gt.f32.partialorder %v320_v22, 0.0 }
 0x131   : > { %v327_v26 = vmin.f32 %v322_v24, 0.0  ;;  %vm325_vm2 = vcmp.gt.f32.partialorder %v322_v24, 0.0 }
 0x132   : > { %v329_v27 = vmul.f32 10.0, %v326_v25 }
 0x133   : > { %v330_v28 = vmul.f32 10.0, %v327_v26 }
 0x134   : > { %v331_v29 = vmul.f32 1.442695, %v329_v27 }
 0x135   : > { %v333_v30 = vmul.f32 1.442695, %v330_v28 }
 0x136   : > { %512 = vpow2.f32 %v331_v29 }
 0x137   : > { %514 = vpow2.f32 %v333_v30 }
 0x140   : > { %v513_v32 = vpop.eup %512 }
 0x141   : > { %v515_v33 = vpop.eup %514  ;;  %v447_v34 = vadd.f32 -1.0, %v513_v32 }
 0x142   : > { %v448_v35 = vadd.f32 -1.0, %v515_v33 }
 0x143   : > { %v337_v37 = vmul.f32 0.1, %v447_v34 }
 0x144   : > { %v338_v39 = vmul.f32 0.1, %v448_v35 }
 0x145   : > { %v339_v40 = vsel %vm324_vm1, %v320_v22, %v337_v37 }
 0x146   : > { %v340_v41 = vsel %vm325_vm2, %v322_v24, %v338_v39  ;;  %v353_v42 = vmul.f32 %v346_v36, %v339_v40 }
 0x147   : > { %v354_v43 = vmul.f32 %v350_v38, %v340_v41 }
 0x149   : > { %v355_v44 = vadd.f32 %v354_v43, %v353_v42 }
 0x14b   : > { %356 = vadd.xlane.f32.xlu0 %v355_v44 }
 0x1d8   : > { %v357_v45 = vpop.xlane.xlu0 %356 }
 0x1d9   : > { %360 = vst.msk [vmem:[%s227_s27] sm:$0xff] %vm359_vm3, %v357_v45 }
 0x1da PF: > { %p15_p8 = scmp.ge.s32.totalorder %s688_s25, 4   ;;  %s805_s15 = smov %s604_s16 }
 0x1db   : > { %s806_s16 = smov %s608_s17  ;;  %s807_s17 = smov %s714_s14 }
 0x1dc   : > { %s808_s18 = smov %s688_s25  ;;  %17 = sbr.rel (!%p15_p8) target bundleno = 4 (0x4), region = 80 }
 0x1e3   :  { %380 = vsyncpa [#allocation3], 1 }
 0x1e4   :  { %382 = vsyncpa [#allocation3 + $0x1], 1 }
 0x1e5   :  { %383 = vsyncpa [#allocation5], 1 }

</bundles_post_ra>
